<compile_context>
chip_gen: v5e
topology: v5e:2x2
jax: 0.10.0
libtpu: 0.0.40
codegen_flags: <defaults>
</compile_context>

<pallas_src>
import math

import jax
import jax.numpy as jnp
from jax.experimental import pallas as pl
from jax.experimental.pallas import tpu as pltpu

NEG_SLOPE = 0.01  # torch.nn.LeakyReLU default negative_slope


def _make_stack_kernel(layer_shapes, H, W):
    """Build the fused conv-stack kernel (one batch image per grid step).

    layer_shapes: tuple of (KH, KW, Cin, Cout) per layer (static; Cin of
    layer 0 already includes any lane-padding applied in the wrapper).

    Refs (in order):
      x_ref : [1, H, W*Cin0]            lane-dense image ((W, C) folded on lanes)
      per layer: t_ref [KH, W*Cin, W*Cout]  block-Toeplitz weights
                 b_ref [1, W*Cout]          bias tiled into the interleaved layout
      o_ref : [1, H, W*Cout_last]
      pad_ref : VMEM scratch [Hp_max, WC_max]  (H-halo padding buffer)
    """
    n_layers = len(layer_shapes)

    def kernel(x_ref, *args):
        o_ref = args[2 * n_layers]
        pad_ref = args[2 * n_layers + 1]

        cur = x_ref[0].astype(jnp.float32)                 # [H, W*Cin0]

        for li, (KH, KW, Cin, Cout) in enumerate(layer_shapes):
            t_ref = args[2 * li]                           # [KH, W*Cin, W*Cout]
            b_ref = args[2 * li + 1]                       # [1, W*Cout]
            pad_h = KH // 2
            wc_in = W * Cin
            wc_out = W * Cout

            # ---- 'same' H-padding via the persistent VMEM scratch --------
            # (W-padding is already baked into the Toeplitz weights.)
            if pad_h:
                zrow = jnp.zeros((pad_h, wc_in), jnp.float32)
                pad_ref[0:pad_h, 0:wc_in] = zrow                       # top halo
                pad_ref[pad_h + H:pad_h + H + pad_h, 0:wc_in] = zrow   # bottom halo
            pad_ref[pad_h:pad_h + H, 0:wc_in] = cur                    # interior

            # ---- KH matmuls against block-Toeplitz weights ----------------
            # slab_kh[h, w*Cin+c] == x_padH[h+kh, w, c]; no reshapes needed.
            y = None
            for kh in range(KH):
                slab = pad_ref[kh:kh + H, 0:wc_in]         # [H, W*Cin]
                part = jnp.dot(slab, t_ref[kh],
                               preferred_element_type=jnp.float32)  # [H, W*Cout]
                y = part if y is None else y + part

            y = y + b_ref[...]                             # bias (dense lanes)
            y = jnp.where(y >= 0, y, NEG_SLOPE * y)        # LeakyReLU
            cur = y                                        # [H, W*Cout], lane-dense

        o_ref[0] = cur.astype(o_ref.dtype)

    return kernel


def _block_toeplitz(w, W):
    """Expand HWIO weights [KH,KW,Cin,Cout] -> [KH, W*Cin, W*Cout].

    T[kh][wi*Cin+ci, wo*Cout+co] = w[kh, wi-wo+pad_w, ci, co] (0 outside the
    kernel support), i.e. the 'same' W-padding is baked in.  Valid at
    module-scale W; the W^2 blow-up rules this out for large widths.
    """
    KH, KW, Cin, Cout = w.shape
    pad_w = KW // 2
    wi = jnp.arange(W)[:, None]
    wo = jnp.arange(W)[None, :]
    kw = wi - wo + pad_w                                   # [W, W]
    valid = (kw >= 0) & (kw < KW)
    kw_c = jnp.clip(kw, 0, KW - 1)
    blocks = w[:, kw_c, :, :]                              # [KH, W, W, Cin, Cout]
    blocks = jnp.where(valid[None, :, :, None, None], blocks, 0.0)
    # (kh, wi, wo, ci, co) -> (kh, wi, ci, wo, co) -> [KH, W*Cin, W*Cout]
    return blocks.transpose(0, 1, 3, 2, 4).reshape(KH, W * Cin, W * Cout)


def _pad_channels_for_lanes(W, C, max_blowup=2):
    """Smallest C' >= C with (W*C') % 128 == 0, capped at max_blowup*C."""
    step = 128 // math.gcd(W, 128)
    cp = ((C + step - 1) // step) * step
    return cp if cp <= max_blowup * max(C, 1) else C


def conv2d_stack_same(x_nhwc, params):
    """Fused stride-1 / 'same' / dilation-1 conv+bias+LeakyReLU stack.

    params: list of (w [KH,KW,Cin,Cout], b [Cout]) per layer.
    """
    N, H, W, C0 = x_nhwc.shape

    # Pad input channels so the first layer's lane dim (W*C0) is a multiple
    # of 128 -> full-lane, unmasked vld for the input block.  Zero channels
    # plus matching zero weight rows keep numerics identical.
    C0p = _pad_channels_for_lanes(W, C0)
    if C0p != C0:
        x_nhwc = jnp.concatenate(
            [x_nhwc, jnp.zeros((N, H, W, C0p - C0), x_nhwc.dtype)], axis=-1)

    layer_shapes = []
    flat_inputs = [x_nhwc.reshape(N, H, W * C0p)]   # lane-dense [H, W*C] per image
    in_specs = [pl.BlockSpec((1, H, W * C0p), lambda n: (n, 0, 0))]

    cin_prev = C0p
    for li, (w, b) in enumerate(params):
        KH, KW, Cin, Cout = w.shape
        assert KH % 2 == 1 and KW % 2 == 1, \
            "padding='same' with symmetric k//2 pad requires odd kernel sizes"
        if li == 0 and C0p != C0:
            w = jnp.concatenate(
                [w, jnp.zeros((KH, KW, C0p - C0, Cout), w.dtype)], axis=2)
            Cin = C0p
        assert Cin == cin_prev, (Cin, cin_prev)
        layer_shapes.append((KH, KW, Cin, Cout))

        t = _block_toeplitz(w, W)                       # [KH, W*Cin, W*Cout]
        b_tiled = jnp.tile(b, W).reshape(1, W * Cout)   # bias in interleaved layout
        flat_inputs += [t, b_tiled]
        in_specs += [pl.BlockSpec(t.shape, lambda n: (0, 0, 0)),
                     pl.BlockSpec(b_tiled.shape, lambda n: (0, 0))]
        cin_prev = Cout

    Cout_last = layer_shapes[-1][-1]
    hp_max = H + 2 * max(k_h // 2 for (k_h, _, _, _) in layer_shapes)
    wc_max = max(W * c_in for (_, _, c_in, _) in layer_shapes)

    kernel = _make_stack_kernel(tuple(layer_shapes), H, W)
    out = pl.pallas_call(
        kernel,
        grid=(N,),
        in_specs=in_specs,
        out_specs=pl.BlockSpec((1, H, W * Cout_last), lambda n: (n, 0, 0)),
        out_shape=jax.ShapeDtypeStruct((N, H, W * Cout_last), x_nhwc.dtype),
        scratch_shapes=[pltpu.VMEM((hp_max, wc_max), jnp.float32)],
        compiler_params=pltpu.CompilerParams(
            dimension_semantics=("parallel",),   # megacore sharding on v7x
        ),
    )(*flat_inputs)

    return out.reshape(N, H, W, Cout_last)


class Conv2dPallas:
    """Mirror of brain/modules/CNN.py::Conv2d (inference forward)."""

    def __init__(self, num_layers, channels, kernel_sizes, key,
                 strides=1, padding='same', dilations=1, bias=True):
        assert padding == 'same'
        assert len(channels) == num_layers + 1
        if isinstance(kernel_sizes, int):
            kernel_sizes = [kernel_sizes] * num_layers
        assert strides == 1 and dilations == 1  # module defaults
        self.params = []
        for i in range(num_layers):
            k = kernel_sizes[i]
            cin, cout = channels[i], channels[i + 1]
            key, wk, bk = jax.random.split(key, 3)
            fan_in = cin * k * k
            bound = (1.0 / fan_in) ** 0.5  # PyTorch-style uniform bounds
            w = jax.random.uniform(wk, (k, k, cin, cout), jnp.float32, -bound, bound)
            b = (jax.random.uniform(bk, (cout,), jnp.float32, -bound, bound)
                 if bias else jnp.zeros((cout,), jnp.float32))
            self.params.append((w, b))

    def __call__(self, x_nchw):
        x = jnp.transpose(x_nchw, (0, 2, 3, 1))      # NCHW -> NHWC
        x = conv2d_stack_same(x, self.params)        # fused conv stack
        return jnp.transpose(x, (0, 3, 1, 2))        # NHWC -> NCHW


def _reference_forward(x_nchw, params):
    """Pure-JAX reference (lax conv) for a correctness check."""
    x = jnp.transpose(x_nchw, (0, 2, 3, 1))
    for w, b in params:
        y = jax.lax.conv_general_dilated(
            x, w, window_strides=(1, 1), padding='SAME',
            dimension_numbers=('NHWC', 'HWIO', 'NHWC'))
        y = y + b
        x = jnp.where(y >= 0, y, NEG_SLOPE * y)
    return jnp.transpose(x, (0, 3, 1, 2))


if __name__ == "__main__":
    key = jax.random.PRNGKey(0)
    key, xkey, pkey = jax.random.split(key, 3)

    # Small shapes consistent with the module: 2 conv layers, channels [4, 8, 8].
    x = jax.random.normal(xkey, (2, 4, 16, 16), dtype=jnp.float32)  # NCHW

    model = Conv2dPallas(num_layers=2, channels=[4, 8, 8], kernel_sizes=3, key=pkey)

    out = jax.block_until_ready(model(x))
    assert out.shape == (2, 8, 16, 16), out.shape

    ref = jax.block_until_ready(_reference_forward(x, model.params))
    assert jnp.allclose(out, ref, rtol=1e-4, atol=1e-4), \
        float(jnp.max(jnp.abs(out - ref)))

    print("KERNEL_OK")
</pallas_src>

<mosaic_0001>
module attributes {stable_mosaic.version = 11 : i64} {
  func.func @kernel(%arg0: i32, %arg1: memref<1x16x128xf32, #tpu.memory_space<vmem>>, %arg2: memref<3x128x128xf32, #tpu.memory_space<vmem>>, %arg3: memref<1x128xf32, #tpu.memory_space<vmem>>, %arg4: memref<3x128x128xf32, #tpu.memory_space<vmem>>, %arg5: memref<1x128xf32, #tpu.memory_space<vmem>>, %arg6: memref<1x16x128xf32, #tpu.memory_space<vmem>>, %arg7: memref<18x128xf32, #tpu.memory_space<vmem>>) attributes {dimension_semantics = [#tpu.dimension_semantics<parallel>], iteration_bounds = array<i64: 2>, scalar_prefetch = 0 : i64, scratch_operands = 1 : i64, tpu.core_type = #tpu.core_type<tc>, window_params = [{transform_indices = @transform_0, window_bounds = array<i64: 1, 16, 128>}, {pipeline_mode = #tpu.pipeline_mode<synchronous>, transform_indices = @transform_1, window_bounds = array<i64: 3, 128, 128>}, {pipeline_mode = #tpu.pipeline_mode<synchronous>, transform_indices = @transform_2, window_bounds = array<i64: 1, 128>}, {pipeline_mode = #tpu.pipeline_mode<synchronous>, transform_indices = @transform_3, window_bounds = array<i64: 3, 128, 128>}, {pipeline_mode = #tpu.pipeline_mode<synchronous>, transform_indices = @transform_4, window_bounds = array<i64: 1, 128>}, {transform_indices = @transform_5, window_bounds = array<i64: 1, 16, 128>}]} {
    %c0 = arith.constant 0 : index
    %c0_0 = arith.constant 0 : index
    %c0_1 = arith.constant 0 : index
    %0 = vector.load %arg1[%c0, %c0_0, %c0_1] : memref<1x16x128xf32, #tpu.memory_space<vmem>>, vector<1x16x128xf32>
    %1 = vector.shape_cast %0 : vector<1x16x128xf32> to vector<16x128xf32>
    %cst = arith.constant 0.000000e+00 : f32
    %2 = vector.broadcast %cst : f32 to vector<1x128xf32>
    %c0_2 = arith.constant 0 : index
    %c0_3 = arith.constant 0 : index
    %3 = vector.load %arg7[%c0_2, %c0_3] : memref<18x128xf32, #tpu.memory_space<vmem>>, vector<1x128xf32>
    tpu.vector_store %arg7[%c0_2, %c0_3], %2 {strides = array<i32>} : memref<18x128xf32, #tpu.memory_space<vmem>>, vector<1x128xf32>,
    %c17 = arith.constant 17 : index
    %c0_4 = arith.constant 0 : index
    %4 = vector.load %arg7[%c17, %c0_4] : memref<18x128xf32, #tpu.memory_space<vmem>>, vector<1x128xf32>
    tpu.vector_store %arg7[%c17, %c0_4], %2 {strides = array<i32>} : memref<18x128xf32, #tpu.memory_space<vmem>>, vector<1x128xf32>,
    %c1 = arith.constant 1 : index
    %c0_5 = arith.constant 0 : index
    %5 = vector.load %arg7[%c1, %c0_5] : memref<18x128xf32, #tpu.memory_space<vmem>>, vector<16x128xf32>
    tpu.vector_store %arg7[%c1, %c0_5], %1 {strides = array<i32>} : memref<18x128xf32, #tpu.memory_space<vmem>>, vector<16x128xf32>,
    %c0_6 = arith.constant 0 : index
    %c0_7 = arith.constant 0 : index
    %6 = vector.load %arg7[%c0_6, %c0_7] : memref<18x128xf32, #tpu.memory_space<vmem>>, vector<16x128xf32>
    %c0_8 = arith.constant 0 : index
    %c0_9 = arith.constant 0 : index
    %c0_10 = arith.constant 0 : index
    %7 = vector.load %arg2[%c0_8, %c0_9, %c0_10] : memref<3x128x128xf32, #tpu.memory_space<vmem>>, vector<1x128x128xf32>
    %8 = vector.shape_cast %7 : vector<1x128x128xf32> to vector<128x128xf32>
    %cst_11 = arith.constant dense<0.000000e+00> : vector<16x128xf32>
    %9 = tpu.matmul %6, %8, %cst_11 {dimension_numbers = #tpu.dot_dimension_numbers<[1], [0], [0], [1], [0, 0, 1, 1], [], []>} : vector<16x128xf32>, vector<128x128xf32>, vector<16x128xf32> -> vector<16x128xf32>
    %c1_12 = arith.constant 1 : index
    %c0_13 = arith.constant 0 : index
    %10 = vector.load %arg7[%c1_12, %c0_13] : memref<18x128xf32, #tpu.memory_space<vmem>>, vector<16x128xf32>
    %c1_14 = arith.constant 1 : index
    %c0_15 = arith.constant 0 : index
    %c0_16 = arith.constant 0 : index
    %11 = vector.load %arg2[%c1_14, %c0_15, %c0_16] : memref<3x128x128xf32, #tpu.memory_space<vmem>>, vector<1x128x128xf32>
    %12 = vector.shape_cast %11 : vector<1x128x128xf32> to vector<128x128xf32>
    %cst_17 = arith.constant dense<0.000000e+00> : vector<16x128xf32>
    %13 = tpu.matmul %10, %12, %cst_17 {dimension_numbers = #tpu.dot_dimension_numbers<[1], [0], [0], [1], [0, 0, 1, 1], [], []>} : vector<16x128xf32>, vector<128x128xf32>, vector<16x128xf32> -> vector<16x128xf32>
    %14 = arith.addf %9, %13 : vector<16x128xf32>
    %c2 = arith.constant 2 : index
    %c0_18 = arith.constant 0 : index
    %15 = vector.load %arg7[%c2, %c0_18] : memref<18x128xf32, #tpu.memory_space<vmem>>, vector<16x128xf32>
    %c2_19 = arith.constant 2 : index
    %c0_20 = arith.constant 0 : index
    %c0_21 = arith.constant 0 : index
    %16 = vector.load %arg2[%c2_19, %c0_20, %c0_21] : memref<3x128x128xf32, #tpu.memory_space<vmem>>, vector<1x128x128xf32>
    %17 = vector.shape_cast %16 : vector<1x128x128xf32> to vector<128x128xf32>
    %cst_22 = arith.constant dense<0.000000e+00> : vector<16x128xf32>
    %18 = tpu.matmul %15, %17, %cst_22 {dimension_numbers = #tpu.dot_dimension_numbers<[1], [0], [0], [1], [0, 0, 1, 1], [], []>} : vector<16x128xf32>, vector<128x128xf32>, vector<16x128xf32> -> vector<16x128xf32>
    %19 = arith.addf %14, %18 : vector<16x128xf32>
    %c0_23 = arith.constant 0 : index
    %c0_24 = arith.constant 0 : index
    %20 = vector.load %arg3[%c0_23, %c0_24] : memref<1x128xf32, #tpu.memory_space<vmem>>, vector<1x128xf32>
    %21 = vector.broadcast %20 : vector<1x128xf32> to vector<16x128xf32>
    %22 = arith.addf %19, %21 : vector<16x128xf32>
    %cst_25 = arith.constant 0.000000e+00 : f32
    %23 = vector.broadcast %cst_25 : f32 to vector<16x128xf32>
    %24 = arith.cmpf oge, %22, %23 : vector<16x128xf32>
    %cst_26 = arith.constant 0.00999999977 : f32
    %25 = vector.broadcast %cst_26 : f32 to vector<16x128xf32>
    %26 = arith.mulf %25, %22 : vector<16x128xf32>
    %27 = arith.select %24, %22, %26 : vector<16x128xi1>, vector<16x128xf32>
    %cst_27 = arith.constant 0.000000e+00 : f32
    %28 = vector.broadcast %cst_27 : f32 to vector<1x128xf32>
    %c0_28 = arith.constant 0 : index
    %c0_29 = arith.constant 0 : index
    %29 = vector.load %arg7[%c0_28, %c0_29] : memref<18x128xf32, #tpu.memory_space<vmem>>, vector<1x128xf32>
    tpu.vector_store %arg7[%c0_28, %c0_29], %28 {strides = array<i32>} : memref<18x128xf32, #tpu.memory_space<vmem>>, vector<1x128xf32>,
    %c17_30 = arith.constant 17 : index
    %c0_31 = arith.constant 0 : index
    %30 = vector.load %arg7[%c17_30, %c0_31] : memref<18x128xf32, #tpu.memory_space<vmem>>, vector<1x128xf32>
    tpu.vector_store %arg7[%c17_30, %c0_31], %28 {strides = array<i32>} : memref<18x128xf32, #tpu.memory_space<vmem>>, vector<1x128xf32>,
    %c1_32 = arith.constant 1 : index
    %c0_33 = arith.constant 0 : index
    %31 = vector.load %arg7[%c1_32, %c0_33] : memref<18x128xf32, #tpu.memory_space<vmem>>, vector<16x128xf32>
    tpu.vector_store %arg7[%c1_32, %c0_33], %27 {strides = array<i32>} : memref<18x128xf32, #tpu.memory_space<vmem>>, vector<16x128xf32>,
    %c0_34 = arith.constant 0 : index
    %c0_35 = arith.constant 0 : index
    %32 = vector.load %arg7[%c0_34, %c0_35] : memref<18x128xf32, #tpu.memory_space<vmem>>, vector<16x128xf32>
    %c0_36 = arith.constant 0 : index
    %c0_37 = arith.constant 0 : index
    %c0_38 = arith.constant 0 : index
    %33 = vector.load %arg4[%c0_36, %c0_37, %c0_38] : memref<3x128x128xf32, #tpu.memory_space<vmem>>, vector<1x128x128xf32>
    %34 = vector.shape_cast %33 : vector<1x128x128xf32> to vector<128x128xf32>
    %cst_39 = arith.constant dense<0.000000e+00> : vector<16x128xf32>
    %35 = tpu.matmul %32, %34, %cst_39 {dimension_numbers = #tpu.dot_dimension_numbers<[1], [0], [0], [1], [0, 0, 1, 1], [], []>} : vector<16x128xf32>, vector<128x128xf32>, vector<16x128xf32> -> vector<16x128xf32>
    %c1_40 = arith.constant 1 : index
    %c0_41 = arith.constant 0 : index
    %36 = vector.load %arg7[%c1_40, %c0_41] : memref<18x128xf32, #tpu.memory_space<vmem>>, vector<16x128xf32>
    %c1_42 = arith.constant 1 : index
    %c0_43 = arith.constant 0 : index
    %c0_44 = arith.constant 0 : index
    %37 = vector.load %arg4[%c1_42, %c0_43, %c0_44] : memref<3x128x128xf32, #tpu.memory_space<vmem>>, vector<1x128x128xf32>
    %38 = vector.shape_cast %37 : vector<1x128x128xf32> to vector<128x128xf32>
    %cst_45 = arith.constant dense<0.000000e+00> : vector<16x128xf32>
    %39 = tpu.matmul %36, %38, %cst_45 {dimension_numbers = #tpu.dot_dimension_numbers<[1], [0], [0], [1], [0, 0, 1, 1], [], []>} : vector<16x128xf32>, vector<128x128xf32>, vector<16x128xf32> -> vector<16x128xf32>
    %40 = arith.addf %35, %39 : vector<16x128xf32>
    %c2_46 = arith.constant 2 : index
    %c0_47 = arith.constant 0 : index
    %41 = vector.load %arg7[%c2_46, %c0_47] : memref<18x128xf32, #tpu.memory_space<vmem>>, vector<16x128xf32>
    %c2_48 = arith.constant 2 : index
    %c0_49 = arith.constant 0 : index
    %c0_50 = arith.constant 0 : index
    %42 = vector.load %arg4[%c2_48, %c0_49, %c0_50] : memref<3x128x128xf32, #tpu.memory_space<vmem>>, vector<1x128x128xf32>
    %43 = vector.shape_cast %42 : vector<1x128x128xf32> to vector<128x128xf32>
    %cst_51 = arith.constant dense<0.000000e+00> : vector<16x128xf32>
    %44 = tpu.matmul %41, %43, %cst_51 {dimension_numbers = #tpu.dot_dimension_numbers<[1], [0], [0], [1], [0, 0, 1, 1], [], []>} : vector<16x128xf32>, vector<128x128xf32>, vector<16x128xf32> -> vector<16x128xf32>
    %45 = arith.addf %40, %44 : vector<16x128xf32>
    %c0_52 = arith.constant 0 : index
    %c0_53 = arith.constant 0 : index
    %46 = vector.load %arg5[%c0_52, %c0_53] : memref<1x128xf32, #tpu.memory_space<vmem>>, vector<1x128xf32>
    %47 = vector.broadcast %46 : vector<1x128xf32> to vector<16x128xf32>
    %48 = arith.addf %45, %47 : vector<16x128xf32>
    %cst_54 = arith.constant 0.000000e+00 : f32
    %49 = vector.broadcast %cst_54 : f32 to vector<16x128xf32>
    %50 = arith.cmpf oge, %48, %49 : vector<16x128xf32>
    %cst_55 = arith.constant 0.00999999977 : f32
    %51 = vector.broadcast %cst_55 : f32 to vector<16x128xf32>
    %52 = arith.mulf %51, %48 : vector<16x128xf32>
    %53 = arith.select %50, %48, %52 : vector<16x128xi1>, vector<16x128xf32>
    %c0_56 = arith.constant 0 : index
    %c0_57 = arith.constant 0 : index
    %c0_58 = arith.constant 0 : index
    %54 = vector.load %arg6[%c0_56, %c0_57, %c0_58] : memref<1x16x128xf32, #tpu.memory_space<vmem>>, vector<1x16x128xf32>
    %55 = vector.shape_cast %54 : vector<1x16x128xf32> to vector<16x128xf32>
    %56 = vector.shape_cast %53 : vector<16x128xf32> to vector<1x16x128xf32>
    tpu.vector_store %arg6[%c0_56, %c0_57, %c0_58], %56 {strides = array<i32>} : memref<1x16x128xf32, #tpu.memory_space<vmem>>, vector<1x16x128xf32>,
    return
  }
  func.func @transform_0(%arg0: i32) -> (i32, i32, i32) {
    %c0_i32 = arith.constant 0 : i32
    %c0_i32_0 = arith.constant 0 : i32
    %c0_i32_1 = arith.constant 0 : i32
    return %arg0, %c0_i32, %c0_i32_0 : i32, i32, i32
  }
  func.func @transform_1(%arg0: i32) -> (i32, i32, i32) {
    %c0_i32 = arith.constant 0 : i32
    %c0_i32_0 = arith.constant 0 : i32
    %c0_i32_1 = arith.constant 0 : i32
    %c0_i32_2 = arith.constant 0 : i32
    return %c0_i32, %c0_i32_0, %c0_i32_1 : i32, i32, i32
  }
  func.func @transform_2(%arg0: i32) -> (i32, i32) {
    %c0_i32 = arith.constant 0 : i32
    %c0_i32_0 = arith.constant 0 : i32
    %c0_i32_1 = arith.constant 0 : i32
    return %c0_i32, %c0_i32_0 : i32, i32
  }
  func.func @transform_3(%arg0: i32) -> (i32, i32, i32) {
    %c0_i32 = arith.constant 0 : i32
    %c0_i32_0 = arith.constant 0 : i32
    %c0_i32_1 = arith.constant 0 : i32
    %c0_i32_2 = arith.constant 0 : i32
    return %c0_i32, %c0_i32_0, %c0_i32_1 : i32, i32, i32
  }
  func.func @transform_4(%arg0: i32) -> (i32, i32) {
    %c0_i32 = arith.constant 0 : i32
    %c0_i32_0 = arith.constant 0 : i32
    %c0_i32_1 = arith.constant 0 : i32
    return %c0_i32, %c0_i32_0 : i32, i32
  }
  func.func @transform_5(%arg0: i32) -> (i32, i32, i32) {
    %c0_i32 = arith.constant 0 : i32
    %c0_i32_0 = arith.constant 0 : i32
    %c0_i32_1 = arith.constant 0 : i32
    return %arg0, %c0_i32, %c0_i32_0 : i32, i32, i32
  }
}

</mosaic_0001>

<bundles_post_ra>
// kernel: tpu_custom_call.1
= control target key start
LH: loop header
LB: loop body
LE: loop exit
PB: predicated region body
PF: predicated region fallthrough
CT: control target
= control target key end

     0   :  { %10 = vsyncpa [#allocation4], 0  ;;  %s1177_s0 = inlined_call_operand.hbm [shape: f32[2,16,128], index: 0, kind: input, shape index: {}]   ;;  %s1178_s1 = inlined_call_operand.hbm [shape: f32[3,128,128], index: 1, kind: input, shape index: {}]   ;;  %s1179_s2 = inlined_call_operand.vmem [shape: f32[1,128], index: 2, kind: input, shape index: {}]   ;;  %s1180_s3 = inlined_call_operand.hbm [shape: f32[3,128,128], index: 3, kind: input, shape index: {}]   ;;  %s1181_s4 = inlined_call_operand.vmem [shape: f32[1,128], index: 4, kind: input, shape index: {}]   ;;  %s1182_s5 = inlined_call_operand.hbm [shape: f32[2,16,128], index: 5, kind: output, shape index: {}]  }
   0x1   :  { %12 = vsyncpa [#allocation4 + $0x1], 0 }
   0x2   :  { %13 = vsyncpa [#allocation7], 0 }
   0x3   :  { %14 = vsyncpa [#allocation5], 0 }
   0x4   :  { %16 = vsyncpa [#allocation5 + $0x1], 0  ;;  %s1001_s18 = smov 0   ;;  %s1003_s19 = smov 0  }
   0x5   :  { %s1005_s20 = smov 0   ;;  %s1007_s21 = smov 0  }
   0x6 LB: > { %s1022_s22 = sadd.s32 4294967295, %s962_s21   ;;  %s676_s23 = sadd.s32 4294967294, %s962_s21   ;;  %s962_s21 = sphi %s1007_s21, %s1194_s21   ;;  %s958_s20 = sphi %s1005_s20, %s1193_s20   ;;  %s954_s19 = sphi %s1003_s19, %s1192_s19   ;;  %s950_s18 = sphi %s1001_s18, %s1191_s18  }
   0x7   : > { %p42_p0 = scmp.ne.s32.totalorder %s954_s19, %s950_s18  ;;  %p43_p1 = scmp.eq.s32.totalorder %s1022_s22, 0 }
   0x8   : > { %p150_p2 = scmp.eq.s32.totalorder %s1022_s22, 1  ;;  %p156_p3 = scmp.eq.s32.totalorder %s676_s23, 1 }
   0x9   : > { %p1031_p4 = por %p43_p1, %p42_p0  ;;  %p677_p5 = scmp.ge.s32.totalorder %s962_s21, 1 }
   0xa   : > { %p1036_p6 = por %p156_p3, %p42_p0  ;;  %p163_p7 = scmp.lt.s32.totalorder %s962_s21, 3 }
   0xb   : > { %s174_s28 = sshll.u32 %s1178_s1, 4  ;;  %s964_s30 = smov [#allocation6]   ;;  %s175_s28 = int_to_ptr.hbm [resolvable:$true] %s174_s28 }
   0xc   : > { %p1044_p8 = pnand %p677_p5, %p163_p7  ;;  %s176_s6 = sshll.u32 %s964_s30, 4  ;;  %s177_s6 = int_to_ptr.vmem [resolvable:$true] %s176_s6 }
   0xd   : > { %s191_s9 = sshll.u32 %s1180_s3, 4  ;;  %s1183_s10 = smov 128   ;;  %s192_s9 = int_to_ptr.hbm [resolvable:$true] %s191_s9 }
   0xe   : > { %p740_p9 = pneg %p1044_p8  ;;  %s966_s11 = smov 8  }
   0xf   : > { %s967_s12 = smov [#allocation8]   ;;  %s1063_s14 = sadd.s32 1, %s962_s21  }
  0x10   : > { %p741_p10 = pnand %p740_p9, %p43_p1  ;;  %s193_s13 = sshll.u32 %s967_s12, 4  ;;  %s194_s13 = int_to_ptr.vmem [resolvable:$true] %s193_s13 }
  0x11   : > { %s29_s15 = sadd.s32 1, %s958_s20  ;;  %s26_s16 = ssub.s32 %s962_s21, %s1063_s14 }
  0x12   : > { %743 = dma.hbm_to_vmem [thread:$0]  (!%p741_p10), %s175_s28, 6144, %s177_s6, [#allocation7], %s1183_s10, %s1183_s10, %s966_s11  }
  0x13   : > { %746 = dma.hbm_to_vmem [thread:$0]  (!%p741_p10), %s192_s9, 6144, %s194_s13, [#allocation7], %s1183_s10, %s1183_s10, %s966_s11  }
  0x14   : > { %p36_p12 = scmp.ne.s32.totalorder %s958_s20, %s954_s19  ;;  %p27_p13 = scmp.eq.s32.totalorder %s26_s16, 0 }
  0x15   : > { %p37_p0 = scmp.eq.s32.totalorder %s962_s21, 0  ;;  %p757_p5 = scmp.lt.s32.totalorder %s962_s21, 2 }
  0x16   : > { %p1073_p3 = por %p150_p2, %p36_p12  ;;  %s210_s26 = sand.u32 1, %s958_s20  }
  0x17   : > { %s1079_s23 = scalar_select %p27_p13, %s958_s20, %s29_s15  }
  0x18   : > { %p38_p7 = por %p37_p0, %p36_p12  ;;  %s681_s27 = sshll.u32 %s210_s26, 4 }
  0x19   : > { %s694_s28 = sshll.u32 %s962_s21, 4  ;;  %s214_s8 = scalar_lea.vmem [#allocation3], %s681_s27 }
  0x1a   : > { %s219_s7 = scalar_lea.hbm %s1177_s0, %s694_s28  ;;  %s222_s9 = sshll.u32 %s214_s8, 4  ;;  %s223_s9 = int_to_ptr.vmem [resolvable:$true] %s222_s9 }
  0x1b   : > { %s220_s12 = sshll.u32 %s219_s7, 4  ;;  %p1086_p2 = pnand %p757_p5, %p38_p7  ;;  %s221_s12 = int_to_ptr.hbm [resolvable:$true] %s220_s12 }
  0x1c   : > { %s211_s15 = scalar_lea.sflag [#allocation4], %s210_s26  ;;  %s862_s16 = sshra.s32 %s221_s12, 4  ;;  %s863_s16 = int_to_ptr.hbm [resolvable:$true] %s862_s16 }
  0x1d   : > { %s864_s10 = scalar_lea.hbm %s863_s16, 16  ;;  %p866_p10 = pneg %p1086_p2 }
  0x1e   : > { %p865_p9 = scmp.ne.s32.totalorder %s863_s16, %s864_s10  ;;  %s869_s30 = scalar_lea.hbm %s1177_s0, 32 }
  0x1f   : > { %p870_p0 = scmp.lt.s32.totalorder %s863_s16, %s1177_s0  ;;  %p871_p5 = scmp.lt.s32.totalorder %s869_s30, %s864_s10 }
  0x20   : > { %p867_p12 = pnand %p866_p10, %p865_p9 }
  0x21   : > { %p872_p7 = por %p871_p5, %p870_p0 }
  0x22   : > { %p868_p13 = pneg %p867_p12 }
  0x24   : > { %p873_p11 = pnand %p872_p7, %p868_p13 }
  0x26   : > { %876 = shalt.err (!%p873_p11)
}
  0x27   : > { %s1189_s26 = smov 128   ;;  %234 = sbr.rel (%p1044_p8) target bundleno = 379 (0x17b), region = 40 }
  0x28   : > { %750 = dma.hbm_to_vmem [thread:$0]  (!%p1086_p2), %s221_s12, 256, %s223_s9, %s211_s15, %s1189_s26, %s1189_s26, %s966_s11  }
  0x29   : > { %s1106_s8 = sand.u32 (!%p1044_p8), 1, %s954_s19  }
  0x2a   : > { %s685_s10 = sshll.u32 (!%p1044_p8), %s1106_s8, 4  ;;  %s237_s16 = scalar_lea.sflag (!%p1044_p8), [#allocation4], %s1106_s8 }
  0x2b   : > { %s1112_s28 = scalar_lea.vmem (!%p1044_p8), [#allocation3], %s685_s10 }
  0x2c   : > { %937 = dma.done.wait (%p1031_p4), %s237_s16, 256  }
  0x2d   : > { %939 = vsyncadd (%p1031_p4), %s237_s16, 4294967040 }
  0x2e   : > { %941 = dma.done.wait (%p43_p1), [#allocation7], 12288  }
  0x2f   : > { %943 = vsyncadd (%p43_p1), [#allocation7], 4294955008  ;;  %v968_v0 = vmov 0.0   ;;  %v385_v1 = vld [vmem:[#allocation6 + $0x178] sm:$0xff]  ;;  %v384_v2 = vld [vmem:[#allocation6 + $0x170] sm:$0xff]  ;;  %s695_s12 = sshll.u32 %s1022_s22, 4 }
  0x30   : > { %280 = vst [vmem:[#allocation2] sm:$0x1] %v968_v0  ;;  %v320_v3 = vld [vmem:[#allocation6 + $0xf8] sm:$0xff]  ;;  %386 = vmatpush.msra.mxu2 %v385_v1  ;;  %v319_v5 = vld [vmem:[#allocation6 + $0xf0] sm:$0xff]  ;;  %v383_v6 = vld [vmem:[#allocation6 + $0x168] sm:$0xff]  ;;  %s580_s27 = scalar_lea.hbm %s1182_s5, %s695_s12  ;;  %s277_s30 = scalar_lea.vmem [#allocation9], %s685_s10 }
  0x31   : > { %281 = vst [vmem:[#allocation2 + $0x11] sm:$0x1] %v968_v0  ;;  %321 = vmatpush.msra.mxu0 %v320_v3  ;;  %v301_v4 = vld [vmem:[#allocation6 + $0x78] sm:$0xff]  ;;  %v300_v7 = vld [vmem:[#allocation6 + $0x70] sm:$0xff]  ;;  %v318_v8 = vld [vmem:[#allocation6 + $0xe8] sm:$0xff]  ;;  %s581_s6 = sshll.u32 %s277_s30, 4  ;;  %s582_s6 = int_to_ptr.vmem [resolvable:$true] %s581_s6 }
  0x32   : > { %344 = vmatpush.msra.mxu1 %v301_v4  ;;  %387 = vmatpush.msra.mxu2 %v384_v2  ;;  %v299_v9 = vld [vmem:[#allocation6 + $0x68] sm:$0xff]  ;;  %v382_v10 = vld [vmem:[#allocation6 + $0x160] sm:$0xff]  ;;  %v381_v13 = vld [vmem:[#allocation6 + $0x158] sm:$0xff]  ;;  %s583_s7 = sshll.u32 %s580_s27, 4  ;;  %s569_s22 = scalar_lea.sflag [#allocation5], %s1106_s8  ;;  %s584_s7 = int_to_ptr.hbm [resolvable:$true] %s583_s7 }
  0x33   : > { %322 = vmatpush.msra.mxu0 %v319_v5  ;;  %v317_v11 = vld [vmem:[#allocation6 + $0xe0] sm:$0xff]  ;;  %v316_v14 = vld [vmem:[#allocation6 + $0xd8] sm:$0xff]  ;;  %v380_v16 = vld [vmem:[#allocation6 + $0x150] sm:$0xff]  ;;  %s906_s26 = sshra.s32 %s584_s7, 4  ;;  %s912_s24 = scalar_lea.hbm %s1182_s5, 32  ;;  %s907_s26 = int_to_ptr.hbm [resolvable:$true] %s906_s26 }
  0x34   : > { %345 = vmatpush.msra.mxu1 %v300_v7  ;;  %388 = vmatpush.msra.mxu2 %v383_v6  ;;  %v298_v12 = vld [vmem:[#allocation6 + $0x60] sm:$0xff]  ;;  %v297_v15 = vld [vmem:[#allocation6 + $0x58] sm:$0xff]  ;;  %v315_v17 = vld [vmem:[#allocation6 + $0xd0] sm:$0xff]  ;;  %s908_s16 = scalar_lea.hbm %s907_s26, 16  ;;  %p913_p11 = scmp.lt.s32.totalorder %s907_s26, %s1182_s5 }
  0x35   : > { %323 = vmatpush.msra.mxu0 %v318_v8  ;;  %v296_v18 = vld [vmem:[#allocation6 + $0x50] sm:$0xff]  ;;  %v379_v19 = vld [vmem:[#allocation6 + $0x148] sm:$0xff]  ;;  %v378_v22 = vld [vmem:[#allocation6 + $0x140] sm:$0xff]  ;;  %p909_p1 = scmp.ne.s32.totalorder %s907_s26, %s908_s16  ;;  %p914_p2 = scmp.lt.s32.totalorder %s912_s24, %s908_s16 }
  0x36   : > { %346 = vmatpush.msra.mxu1 %v299_v9  ;;  %389 = vmatpush.msra.mxu2 %v382_v10  ;;  %v314_v20 = vld [vmem:[#allocation6 + $0xc8] sm:$0xff]  ;;  %v313_v23 = vld [vmem:[#allocation6 + $0xc0] sm:$0xff]  ;;  %v377_v25 = vld [vmem:[#allocation6 + $0x138] sm:$0xff] }
  0x37   : > { %324 = vmatpush.msra.mxu0 %v317_v11  ;;  %v295_v21 = vld [vmem:[#allocation6 + $0x48] sm:$0xff]  ;;  %v294_v24 = vld [vmem:[#allocation6 + $0x40] sm:$0xff]  ;;  %v312_v26 = vld [vmem:[#allocation6 + $0xb8] sm:$0xff]  ;;  %p910_p4 = pnand %p909_p1, %p1073_p3  ;;  %p915_p9 = por %p914_p2, %p913_p11 }
  0x38   : > { %347 = vmatpush.msra.mxu1 %v298_v12  ;;  %390 = vmatpush.msra.mxu2 %v381_v13  ;;  %v1125_v27 = vld [vmem:[%s1112_s28] sm:$0xff]  ;;  %v293_v28 = vld [vmem:[#allocation6 + $0x38] sm:$0xff]  ;;  %v375_v35 = vld [vmem:[#allocation6 + $0x128] sm:$0xff] }
  0x39   : > { %325 = vmatpush.msra.mxu0 %v316_v14  ;;  %v1128_v29 = vld [vmem:[%s1112_s28 + $0x8] sm:$0xff]  ;;  %282 = vst [vmem:[#allocation2 + $0x1] sm:$0xff] %v1125_v27  ;;  %v376_v30 = vld [vmem:[#allocation6 + $0x130] sm:$0xff]  ;;  %v374_v39 = vld [vmem:[#allocation6 + $0x120] sm:$0xff]  ;;  %p911_p8 = pneg %p910_p4 }
  0x3a   : > { %348 = vmatpush.msra.mxu1 %v297_v15  ;;  %391 = vmatpush.msra.mxu2 %v380_v16  ;;  %v311_v31 = vld [vmem:[#allocation6 + $0xb0] sm:$0xff]  ;;  %283 = vst [vmem:[#allocation2 + $0x9] sm:$0xff] %v1128_v29  ;;  %v463_v32 = vld [vmem:[#allocation8 + $0xf8] sm:$0xff]  ;;  %v310_v36 = vld [vmem:[#allocation6 + $0xa8] sm:$0xff] }
  0x3b   : > { %326 = vmatpush.msra.mxu0 %v315_v17  ;;  %v292_v33 = vld [vmem:[#allocation6 + $0x30] sm:$0xff]  ;;  %464 = vmatpush.msra.mxu3 %v463_v32  ;;  %v291_v37 = vld [vmem:[#allocation6 + $0x28] sm:$0xff]  ;;  %v309_v40 = vld [vmem:[#allocation6 + $0xa0] sm:$0xff]  ;;  %p916_p10 = pnand %p915_p9, %p911_p8 }
  0x3c   : > { %349 = vmatpush.msra.mxu1 %v296_v18  ;;  %392 = vmatpush.msra.mxu2 %v379_v19  ;;  %v462_v34 = vld [vmem:[#allocation8 + $0xf0] sm:$0xff]  ;;  %v461_v38 = vld [vmem:[#allocation8 + $0xe8] sm:$0xff]  ;;  %v290_v41 = vld [vmem:[#allocation6 + $0x20] sm:$0xff] }
  0x3d   : > { %327 = vmatpush.msra.mxu0 %v314_v20  ;;  %465 = vmatpush.msra.mxu3 %v462_v34  ;;  %v460_v42 = vld [vmem:[#allocation8 + $0xe0] sm:$0xff]  ;;  %v373_v43 = vld [vmem:[#allocation6 + $0x118] sm:$0xff]  ;;  %v372_v49 = vld [vmem:[#allocation6 + $0x110] sm:$0xff] }
  0x3e   : > { %350 = vmatpush.msra.mxu1 %v295_v21  ;;  %393 = vmatpush.msra.mxu2 %v378_v22  ;;  %v308_v44 = vld [vmem:[#allocation6 + $0x98] sm:$0xff]  ;;  %v307_v50 = vld [vmem:[#allocation6 + $0x90] sm:$0xff]  ;;  %v371_v51 = vld [vmem:[#allocation6 + $0x108] sm:$0xff] }
  0x3f   : > { %328 = vmatpush.msra.mxu0 %v313_v23  ;;  %466 = vmatpush.msra.mxu3 %v461_v38  ;;  %v289_v46 = vld [vmem:[#allocation6 + $0x18] sm:$0xff]  ;;  %v288_v52 = vld [vmem:[#allocation6 + $0x10] sm:$0xff]  ;;  %v306_v54 = vld [vmem:[#allocation6 + $0x88] sm:$0xff] }
  0x40   : > { %351 = vmatpush.msra.mxu1 %v294_v24  ;;  %394 = vmatpush.msra.mxu2 %v377_v25  ;;  %v284_v45 = vld [vmem:[#allocation2] sm:$0xff]  ;;  %v459_v48 = vld [vmem:[#allocation8 + $0xd8] sm:$0xff]  ;;  %v458_v53 = vld [vmem:[#allocation8 + $0xd0] sm:$0xff] }
  0x41   : > { %329 = vmatpush.msra.mxu0 %v312_v26  ;;  %423 = vst [vmem:[#allocation2] sm:$0x1] %v968_v0  ;;  %v368_v47 = vld [vmem:[#allocation2 + $0xa] sm:$0xff]  ;;  %467 = vmatpush.msra.mxu3 %v460_v42  ;;  %v287_v55 = vld [vmem:[#allocation6 + $0x8] sm:$0xff]  ;;  %v370_v57 = vld [vmem:[#allocation6 + $0x100] sm:$0xff] }
  0x42   : > { %352 = vmatpush.msra.mxu1 %v293_v28  ;;  %395 = vmatpush.msra.mxu2 %v376_v30  ;;  %424 = vst [vmem:[#allocation2 + $0x11] sm:$0x1] %v968_v0  ;;  %v457_v56 = vld [vmem:[#allocation8 + $0xc8] sm:$0xff]  ;;  %v305_v58 = vld [vmem:[#allocation6 + $0x80] sm:$0xff]  ;;  %v444_v62 = vld [vmem:[#allocation8 + $0x78] sm:$0xff] }
  0x43   : > { %330 = vmatpush.msra.mxu0 %v311_v31  ;;  %468 = vmatpush.msra.mxu3 %v459_v48  ;;  %v367_v59 = vld [vmem:[#allocation2 + $0x2] sm:$0xff]  ;;  %v286_v60 = vld [vmem:[#allocation6] sm:$0xff]  ;;  %v528_v63 = vld [vmem:[#allocation8 + $0x178] sm:$0xff] }
  0x44   : > { %353 = vmatpush.msra.mxu1 %v292_v33  ;;  %396 = vmatpush.msra.mxu2 %v375_v35  ;;  %v456_v61 = vld [vmem:[#allocation8 + $0xc0] sm:$0xff]  ;;  %v455_v0 = vld [vmem:[#allocation8 + $0xb8] sm:$0xff]  ;;  %v443_v1 = vld [vmem:[#allocation8 + $0x70] sm:$0xff] }
  0x45   : > { %331 = vmatpush.msra.mxu0 %v310_v36  ;;  %469 = vmatpush.msra.mxu3 %v458_v53  ;;  %v527_v2 = vld [vmem:[#allocation8 + $0x170] sm:$0xff]  ;;  %v442_v4 = vld [vmem:[#allocation8 + $0x68] sm:$0xff]  ;;  %v441_v8 = vld [vmem:[#allocation8 + $0x60] sm:$0xff] }
  0x46   : > { %354 = vmatpush.msra.mxu1 %v291_v37  ;;  %397 = vmatpush.msra.mxu2 %v374_v39  ;;  %v454_v3 = vld [vmem:[#allocation8 + $0xb0] sm:$0xff]  ;;  %v526_v5 = vld [vmem:[#allocation8 + $0x168] sm:$0xff]  ;;  %v452_v9 = vld [vmem:[#allocation8 + $0xa0] sm:$0xff] }
  0x47   : > { %332 = vmatpush.msra.mxu0 %v309_v40  ;;  %470 = vmatpush.msra.mxu3 %v457_v56  ;;  %v453_v6 = vld [vmem:[#allocation8 + $0xa8] sm:$0xff]  ;;  %v285_v7 = vld [vmem:[#allocation2 + $0x8] sm:$0xff]  ;;  %v440_v10 = vld [vmem:[#allocation8 + $0x58] sm:$0xff] }
  0x48   : > { %355 = vmatpush.msra.mxu1 %v290_v41  ;;  %398 = vmatpush.msra.mxu2 %v373_v43  ;;  %v451_v11 = vld [vmem:[#allocation8 + $0x98] sm:$0xff]  ;;  %v439_v12 = vld [vmem:[#allocation8 + $0x50] sm:$0xff]  ;;  %v438_v14 = vld [vmem:[#allocation8 + $0x48] sm:$0xff] }
  0x49   : > { %333 = vmatpush.msra.mxu0 %v308_v44  ;;  %471 = vmatpush.msra.mxu3 %v456_v61  ;;  %v450_v13 = vld [vmem:[#allocation8 + $0x90] sm:$0xff]  ;;  %v449_v15 = vld [vmem:[#allocation8 + $0x88] sm:$0xff]  ;;  %v448_v16 = vld [vmem:[#allocation8 + $0x80] sm:$0xff] }
  0x4a   : > { %356 = vmatpush.msra.mxu1 %v289_v46  ;;  %399 = vmatpush.msra.mxu2 %v372_v49  ;;  %v437_v17 = vld [vmem:[#allocation8 + $0x40] sm:$0xff]  ;;  %v436_v19 = vld [vmem:[#allocation8 + $0x38] sm:$0xff]  ;;  %v435_v21 = vld [vmem:[#allocation8 + $0x30] sm:$0xff] }
  0x4b   : > { %334 = vmatpush.msra.mxu0 %v307_v50  ;;  %472 = vmatpush.msra.mxu3 %v455_v0  ;;  %v525_v18 = vld [vmem:[#allocation8 + $0x160] sm:$0xff]  ;;  %v524_v20 = vld [vmem:[#allocation8 + $0x158] sm:$0xff]  ;;  %v523_v22 = vld [vmem:[#allocation8 + $0x150] sm:$0xff] }
  0x4c   : > { %357 = vmatpush.msra.mxu1 %v288_v52  ;;  %400 = vmatpush.msra.mxu2 %v371_v51  ;;  %v434_v23 = vld [vmem:[#allocation8 + $0x28] sm:$0xff]  ;;  %v433_v25 = vld [vmem:[#allocation8 + $0x20] sm:$0xff]  ;;  %v520_v28 = vld [vmem:[#allocation8 + $0x138] sm:$0xff] }
  0x4d   : > { %335 = vmatpush.msra.mxu0 %v306_v54  ;;  %473 = vmatpush.msra.mxu3 %v454_v3  ;;  %v522_v24 = vld [vmem:[#allocation8 + $0x148] sm:$0xff]  ;;  %v521_v26 = vld [vmem:[#allocation8 + $0x140] sm:$0xff]  ;;  %v519_v30 = vld [vmem:[#allocation8 + $0x130] sm:$0xff] }
  0x4e   : > { %358 = vmatpush.msra.mxu1 %v287_v55  ;;  %401 = vmatpush.msra.mxu2 %v370_v57  ;;  %v430_v31 = vld [vmem:[#allocation8 + $0x8] sm:$0xff]  ;;  %v429_v33 = vld [vmem:[#allocation8] sm:$0xff]  ;;  %v516_v35 = vld [vmem:[#allocation8 + $0x118] sm:$0xff] }
  0x4f   : > { %336 = vmatpush.msra.mxu0 %v305_v58  ;;  %402 = vmatmul.f32.vlgmr.msra.gmra.mxu2 %v367_v59  ;;  %v518_v32 = vld [vmem:[#allocation8 + $0x128] sm:$0xff]  ;;  %v517_v34 = vld [vmem:[#allocation8 + $0x120] sm:$0xff]  ;;  %v515_v36 = vld [vmem:[#allocation8 + $0x110] sm:$0xff] }
  0x50   : > { %359 = vmatpush.msra.mxu1 %v286_v60  ;;  %337 = vmatmul.f32.vlgmr.msra.gmra.mxu0 %v1125_v27  ;;  %v432_v27 = vld [vmem:[#allocation8 + $0x18] sm:$0xff]  ;;  %v514_v37 = vld [vmem:[#allocation8 + $0x108] sm:$0xff]  ;;  %v513_v38 = vld [vmem:[#allocation8 + $0x100] sm:$0xff] }
  0x51   : > { %360 = vmatmul.f32.vlgmr.msra.gmra.mxu1 %v284_v45  ;;  %487 = vmatpush.msrb.mxu0 %v444_v62  ;;  %v800_v42 = vld [vmem:[%s1179_s2] ss:$0 sm:$0xff] }
  0x52   : > { %696 = vmatpush.msrb.mxu2 %v444_v62  ;;  %529 = vmatpush.msrb.mxu1 %v528_v63  ;;  %v801_v0 = vld [vmem:[%s1181_s4] ss:$0 sm:$0xff] }
  0x53   : > { %488 = vmatpush.msrb.mxu0 %v443_v1  ;;  %474 = vmatpush.msra.mxu3 %v453_v6 }
  0x54   : > { %697 = vmatpush.msrb.mxu2 %v443_v1  ;;  %530 = vmatpush.msrb.mxu1 %v527_v2 }
  0x55   : > { %489 = vmatpush.msrb.mxu0 %v442_v4  ;;  %475 = vmatpush.msra.mxu3 %v452_v9 }
  0x56   : > { %698 = vmatpush.msrb.mxu2 %v442_v4  ;;  %531 = vmatpush.msrb.mxu1 %v526_v5 }
  0x57   : > { %405 = vmatmul.f32.gmra.mxu2 %v368_v47  ;;  %490 = vmatpush.msrb.mxu0 %v441_v8 }
  0x58   : > { %340 = vmatmul.f32.gmra.mxu0 %v1128_v29  ;;  %699 = vmatpush.msrb.mxu2 %v441_v8  ;;  %v431_v29 = vld [vmem:[#allocation8 + $0x10] sm:$0xff] }
  0x59   : > { %363 = vmatmul.f32.gmra.mxu1 %v285_v7  ;;  %491 = vmatpush.msrb.mxu0 %v440_v10 }
  0x5a   : > { %476 = vmatpush.msra.mxu3 %v451_v11  ;;  %700 = vmatpush.msrb.mxu2 %v440_v10 }
  0x5b   : > { %492 = vmatpush.msrb.mxu0 %v439_v12  ;;  %532 = vmatpush.msrb.mxu1 %v525_v18 }
  0x5c   : > { %477 = vmatpush.msra.mxu3 %v450_v13  ;;  %701 = vmatpush.msrb.mxu2 %v439_v12 }
  0x5d   : > { %493 = vmatpush.msrb.mxu0 %v438_v14  ;;  %533 = vmatpush.msrb.mxu1 %v524_v20 }
  0x5e   : > { %702 = vmatpush.msrb.mxu2 %v438_v14  ;;  %478 = vmatpush.msra.mxu3 %v449_v15 }
  0x5f   : > { %494 = vmatpush.msrb.mxu0 %v437_v17  ;;  %534 = vmatpush.msrb.mxu1 %v523_v22 }
  0x60   : > { %479 = vmatpush.msra.mxu3 %v448_v16  ;;  %703 = vmatpush.msrb.mxu2 %v437_v17 }
  0x61   : > { %495 = vmatpush.msrb.mxu0 %v436_v19  ;;  %535 = vmatpush.msrb.mxu1 %v522_v24 }
  0x62   : > { %712 = vmatpush.msrb.mxu3 %v528_v63  ;;  %704 = vmatpush.msrb.mxu2 %v436_v19 }
  0x63   : > { %496 = vmatpush.msrb.mxu0 %v435_v21  ;;  %536 = vmatpush.msrb.mxu1 %v521_v26 }
  0x64   : > { %713 = vmatpush.msrb.mxu3 %v527_v2  ;;  %705 = vmatpush.msrb.mxu2 %v435_v21 }
  0x65   : > { %497 = vmatpush.msrb.mxu0 %v434_v23  ;;  %537 = vmatpush.msrb.mxu1 %v520_v28 }
  0x66   : > { %714 = vmatpush.msrb.mxu3 %v526_v5  ;;  %706 = vmatpush.msrb.mxu2 %v434_v23 }
  0x67   : > { %498 = vmatpush.msrb.mxu0 %v433_v25  ;;  %538 = vmatpush.msrb.mxu1 %v519_v30 }
  0x68   : > { %715 = vmatpush.msrb.mxu3 %v525_v18  ;;  %707 = vmatpush.msrb.mxu2 %v433_v25 }
  0x69   : > { %499 = vmatpush.msrb.mxu0 %v432_v27  ;;  %539 = vmatpush.msrb.mxu1 %v518_v32 }
  0x6a   : > { %716 = vmatpush.msrb.mxu3 %v524_v20  ;;  %708 = vmatpush.msrb.mxu2 %v432_v27 }
  0x6b   : > { %500 = vmatpush.msrb.mxu0 %v431_v29  ;;  %540 = vmatpush.msrb.mxu1 %v517_v34 }
  0x6c   : > { %717 = vmatpush.msrb.mxu3 %v523_v22  ;;  %709 = vmatpush.msrb.mxu2 %v431_v29 }
  0x6d   : > { %501 = vmatpush.msrb.mxu0 %v430_v31  ;;  %541 = vmatpush.msrb.mxu1 %v516_v35 }
  0x6e   : > { %718 = vmatpush.msrb.mxu3 %v522_v24  ;;  %710 = vmatpush.msrb.mxu2 %v430_v31 }
  0x6f   : > { %502 = vmatpush.msrb.mxu0 %v429_v33  ;;  %542 = vmatpush.msrb.mxu1 %v515_v36 }
  0x70   : > { %719 = vmatpush.msrb.mxu3 %v521_v26  ;;  %711 = vmatpush.msrb.mxu2 %v429_v33 }
  0x71   : > { %543 = vmatpush.msrb.mxu1 %v514_v37 }
  0x72   : > { %720 = vmatpush.msrb.mxu3 %v520_v28 }
  0x73   : > { %544 = vmatpush.msrb.mxu1 %v513_v38 }
  0x74   : > { %721 = vmatpush.msrb.mxu3 %v519_v30 }
  0x76   : > { %722 = vmatpush.msrb.mxu3 %v518_v32 }
  0x78   : > { %723 = vmatpush.msrb.mxu3 %v517_v34 }
  0x7a   : > { %724 = vmatpush.msrb.mxu3 %v516_v35 }
  0x7c   : > { %725 = vmatpush.msrb.mxu3 %v515_v36 }
  0x7e   : > { %726 = vmatpush.msrb.mxu3 %v514_v37 }
  0x80   : > { %727 = vmatpush.msrb.mxu3 %v513_v38 }
  0xcd   : > { %v338_v39 = vpop.f32.mrf.mxu0 }
  0xce   : > { %v361_v40 = vpop.f32.mrf.mxu1 }
  0xcf   : > { %v362_v41 = vadd.f32 %v361_v40, %v338_v39 }
  0xd2   : > { %v403_v43 = vpop.f32.mrf.mxu2 }
  0xd3   : > { %v409_v44 = vadd.f32 %v403_v43, %v362_v41 }
  0xd5   : > { %v415_v45 = vadd.f32 %v800_v42, %v409_v44  ;;  %v341_v46 = vpop.f32.mrf.mxu0 }
  0xd6   : > { %v364_v47 = vpop.f32.mrf.mxu1 }
  0xd7   : > { %vm417_vm0 = vcmp.ge.f32.partialorder %v415_v45, 0.0  ;;  %v419_v48 = vmul.f32 0.01, %v415_v45  ;;  %v365_v49 = vadd.f32 %v364_v47, %v341_v46 }
  0xd9   : > { %v421_v50 = vsel %vm417_vm0, %v415_v45, %v419_v48 }
  0xda   : > { %425 = vst [vmem:[#allocation2 + $0x1] sm:$0xff] %v421_v50  ;;  %v406_v51 = vpop.f32.mrf.mxu2  ;;  %480 = vmatmul.f32.vlgmr.msra.gmra.mxu3 %v421_v50 }
  0xdb   : > { %v410_v52 = vadd.f32 %v406_v51, %v365_v49 }
  0xdd   : > { %v416_v53 = vadd.f32 %v800_v42, %v410_v52 }
  0xdf   : > { %vm418_vm1 = vcmp.ge.f32.partialorder %v416_v53, 0.0  ;;  %v420_v54 = vmul.f32 0.01, %v416_v53 }
  0xe1   : > { %v422_v55 = vsel %vm418_vm1, %v416_v53, %v420_v54  ;;  %v427_v56 = vld [vmem:[#allocation2] sm:$0xff] }
  0xe2   : > { %426 = vst [vmem:[#allocation2 + $0x9] sm:$0xff] %v422_v55  ;;  %503 = vmatmul.f32.vlgmr.msrb.gmra.mxu0 %v427_v56  ;;  %483 = vmatmul.f32.gmra.mxu3 %v422_v55 }
  0xe9   : > { %v428_v57 = vld [vmem:[#allocation2 + $0x8] sm:$0xff] }
  0xea   : > { %v510_v58 = vld [vmem:[#allocation2 + $0x2] sm:$0xff]  ;;  %v511_v59 = vld [vmem:[#allocation2 + $0xa] sm:$0xff]  ;;  %506 = vmatmul.f32.vlgmr.msrb.gmra.mxu2 %v428_v57 }
  0xeb   : > { %545 = vmatmul.f32.vlgmr.msrb.gmra.mxu1 %v510_v58  ;;  %548 = vmatmul.f32.vlgmr.msrb.gmra.mxu3 %v511_v59 }
 0x15d   : > { %v481_v60 = vpop.f32.mrf.mxu3 }
 0x15f   : > { %v504_v61 = vpop.f32.mrf.mxu0 }
 0x160   : > { %v505_v63 = vadd.f32 %v504_v61, %v481_v60 }
 0x165   : > { %v484_v62 = vpop.f32.mrf.mxu3 }
 0x168   : > { %v546_v1 = vpop.f32.mrf.mxu1 }
 0x169   : > { %v552_v2 = vadd.f32 %v546_v1, %v505_v63 }
 0x16b   : > { %v558_v3 = vadd.f32 %v801_v0, %v552_v2 }
 0x16d   : > { %vm560_vm2 = vcmp.ge.f32.partialorder %v558_v3, 0.0  ;;  %v562_v4 = vmul.f32 0.01, %v558_v3  ;;  %v507_v5 = vpop.f32.mrf.mxu2 }
 0x16e   : > { %v508_v7 = vadd.f32 %v507_v5, %v484_v62  ;;  %v549_v8 = vpop.f32.mrf.mxu3 }
 0x16f   : > { %v564_v6 = vsel %vm560_vm2, %v558_v3, %v562_v4 }
 0x170   : > { %566 = vst [vmem:[%s277_s30] sm:$0xff] %v564_v6  ;;  %v553_v9 = vadd.f32 %v549_v8, %v508_v7 }
 0x172   : > { %v559_v10 = vadd.f32 %v801_v0, %v553_v9 }
 0x174   : > { %vm561_vm3 = vcmp.ge.f32.partialorder %v559_v10, 0.0  ;;  %v563_v11 = vmul.f32 0.01, %v559_v10 }
 0x176   : > { %v565_v12 = vsel %vm561_vm3, %v559_v10, %v563_v11 }
 0x177   : > { %567 = vst [vmem:[%s277_s30 + $0x8] sm:$0xff] %v565_v12 }
 0x178   : > { %919 = shalt.err (!%p916_p10)
}
 0x179   : > { %s969_s8 = smov 128   ;;  %s970_s9 = smov 8  }
 0x17a   : > { %738 = dma.vmem_to_hbm [thread:$0]  (%p1073_p3), %s582_s6, 256, %s584_s7, %s569_s22, %s969_s8, %s969_s8, %s970_s9  }
 0x17b PF: > { %s598_s12 = sand.u32 1, %s950_s18   ;;  %p1190_p12 = scmp.ge.s32.totalorder %s962_s21, 2 }
 0x17c   : > { %s599_s13 = scalar_lea.sflag [#allocation5], %s598_s12 }
 0x17d   : > { %p752_p13 = pnand %p1190_p12, %p1036_p6 }
 0x17f   : > { %p753_p0 = pneg %p752_p13 }
 0x181   : > { %945 = dma.done.wait (%p753_p0), %s599_s13, 256  }
 0x182   : > { %947 = vsyncadd (%p753_p0), %s599_s13, 4294967040  ;;  %p19_p5 = scmp.ge.s32.totalorder %s1063_s14, 4   ;;  %s1191_s18 = smov %s954_s19 }
 0x183   : > { %s1192_s19 = smov %s958_s20  ;;  %s1193_s20 = smov %s1079_s23 }
 0x184   : > { %s1194_s21 = smov %s1063_s14  ;;  %21 = sbr.rel (!%p19_p5) target bundleno = 6 (0x6), region = 97 }
 0x189   :  { %605 = vsyncpa [#allocation4], 1 }
 0x18a   :  { %607 = vsyncpa [#allocation4 + $0x1], 1 }
 0x18b   :  { %608 = vsyncpa [#allocation7], 1 }
 0x18c   :  { %609 = vsyncpa [#allocation5], 1 }
 0x18d   :  { %611 = vsyncpa [#allocation5 + $0x1], 1 }

</bundles_post_ra>
